<compile_context>
chip_gen: v7x
topology: tpu7x:2x2x1
jax: 0.10.0
libtpu: 0.0.40
codegen_flags: <defaults>
</compile_context>

<pallas_src>
import functools

import jax
import jax.numpy as jnp
import numpy as np
from jax import lax
from jax.experimental import pallas as pl
from jax.experimental.pallas import tpu as pltpu


def _round_up(x, m):
    return ((x + m - 1) // m) * m


# ---------------------------------------------------------------------------
# edge combination functions (transposed layout: [V, TE]); elementwise, so the
# formulas are identical to the PyTorch [E, V] versions.
# ---------------------------------------------------------------------------
def _combine_elementwise(edge_fn, s, d):
    if edge_fn == "add":
        return s + d
    if edge_fn == "mul":
        return s * d
    if edge_fn == "mean":
        return (s + d) * 0.5
    if edge_fn == "max":
        return jnp.maximum(s, d)
    if edge_fn == "weighted_l1":
        return jnp.abs(s - d)
    if edge_fn == "weighted_l2":
        return (s - d) ** 2
    raise ValueError('Invalid edge function "{}".'.format(edge_fn))


# ---------------------------------------------------------------------------
# in-kernel vectorized gather: one-hot [N_pad, TE] built from the index tile,
# then an MXU matmul against the (transposed) embedding table.
# ---------------------------------------------------------------------------
def _gather_transposed(src_ref, dst_ref, emb_ref):
    n_pad = emb_ref.shape[1]
    te = src_ref.shape[1]
    node_iota = lax.broadcasted_iota(jnp.int32, (n_pad, te), 0)
    oh_src = (node_iota == src_ref[...]).astype(emb_ref.dtype)   # (N_pad, TE)
    oh_dst = (node_iota == dst_ref[...]).astype(emb_ref.dtype)   # (N_pad, TE)
    # (V_pad, N_pad) @ (N_pad, TE) -> (V_pad, TE), exact row selection, f32 acc.
    s_t = jnp.dot(emb_ref[...], oh_src, preferred_element_type=jnp.float32)
    d_t = jnp.dot(emb_ref[...], oh_dst, preferred_element_type=jnp.float32)
    return s_t, d_t


def _concat_kernel(src_ref, dst_ref, emb_ref, w_src_ref, w_dst_ref, b_ref, out_ref):
    # out^T = W_src @ s^T + W_dst @ d^T + b   (no [TE, 2V] concat materialized)
    s_t, d_t = _gather_transposed(src_ref, dst_ref, emb_ref)
    acc = jnp.dot(w_src_ref[...], s_t.astype(w_src_ref.dtype),
                  preferred_element_type=jnp.float32)
    acc = acc + jnp.dot(w_dst_ref[...], d_t.astype(w_dst_ref.dtype),
                        preferred_element_type=jnp.float32)
    out_ref[...] = (acc + b_ref[...]).astype(out_ref.dtype)


def _elementwise_kernel(edge_fn, src_ref, dst_ref, emb_ref, w_ref, b_ref, out_ref):
    s_t, d_t = _gather_transposed(src_ref, dst_ref, emb_ref)
    comb = _combine_elementwise(edge_fn, s_t, d_t)               # f32, (V_pad, TE)
    acc = jnp.dot(w_ref[...], comb.astype(w_ref.dtype),
                  preferred_element_type=jnp.float32)
    out_ref[...] = (acc + b_ref[...]).astype(out_ref.dtype)


# ---------------------------------------------------------------------------
# wrapper: out = Linear(edge_fn(tensor[src], tensor[dst]))
# ---------------------------------------------------------------------------
def edge_inference_forward(node_embeddings, src_idx, dst_idx, weight, bias, *,
                           edge_fn="concat", edge_tile=128,
                           compute_dtype=jnp.float32):
    """Pallas equivalent of EdgeInferenceModel's post-embedding forward path.

    compute_dtype=jnp.bfloat16 halves embedding/weight VMEM+HBM traffic (the
    kernel is gather/memory bound); f32 accumulation is kept either way.
    """
    num_nodes, vector_size = node_embeddings.shape
    num_edges = int(src_idx.shape[0])
    num_outputs, feat_dim = weight.shape
    assert feat_dim == vector_size * (2 if edge_fn == "concat" else 1)
    assert bias.shape == (num_outputs,)
    if edge_fn == "model":
        # TODO(synk): edge_fn == 'model' uses an arbitrary nested edge_model; not lowered here.
        raise NotImplementedError("edge_fn='model' is not lowered to Pallas")

    v_pad = _round_up(vector_size, 8)
    n_pad = _round_up(max(num_nodes, 1), 128)
    o_pad = _round_up(num_outputs, 8)
    e_pad = _round_up(max(num_edges, 1), edge_tile)
    n_tiles = e_pad // edge_tile

    # TODO(synk): for very large graphs the [V_pad, N_pad] table should stay in
    # HBM (pl.ANY) with a per-tile DMA row gather; here it is VMEM-resident.
    emb_t = jnp.zeros((v_pad, n_pad), compute_dtype)
    emb_t = emb_t.at[:vector_size, :num_nodes].set(
        jnp.transpose(node_embeddings).astype(compute_dtype))

    def pad_idx(idx):
        p = jnp.zeros((e_pad,), jnp.int32).at[:num_edges].set(idx.astype(jnp.int32))
        return p.reshape(1, e_pad)           # lane-dense index row, padded with node 0

    src_p = pad_idx(src_idx)
    dst_p = pad_idx(dst_idx)

    bias_p = jnp.zeros((o_pad, 1), jnp.float32)
    bias_p = bias_p.at[:num_outputs, 0].set(bias.astype(jnp.float32))

    def w_block(w_slice):
        wp = jnp.zeros((o_pad, v_pad), compute_dtype)
        return wp.at[:num_outputs, :vector_size].set(w_slice.astype(compute_dtype))

    idx_spec = pl.BlockSpec((1, edge_tile), lambda i: (0, i))

    def full_spec(shape):
        return pl.BlockSpec(shape, lambda i: (0, 0))

    if edge_fn == "concat":
        w1 = w_block(weight[:, :vector_size])
        w2 = w_block(weight[:, vector_size:])
        kernel = _concat_kernel
        operands = (src_p, dst_p, emb_t, w1, w2, bias_p)
        in_specs = [idx_spec, idx_spec, full_spec((v_pad, n_pad)),
                    full_spec((o_pad, v_pad)), full_spec((o_pad, v_pad)),
                    full_spec((o_pad, 1))]
    else:
        w1 = w_block(weight)
        kernel = functools.partial(_elementwise_kernel, edge_fn)
        operands = (src_p, dst_p, emb_t, w1, bias_p)
        in_specs = [idx_spec, idx_spec, full_spec((v_pad, n_pad)),
                    full_spec((o_pad, v_pad)), full_spec((o_pad, 1))]

    out_t = pl.pallas_call(
        kernel,
        out_shape=jax.ShapeDtypeStruct((o_pad, e_pad), jnp.float32),
        grid_spec=pltpu.PrefetchScalarGridSpec(
            num_scalar_prefetch=0,
            grid=(n_tiles,),
            in_specs=in_specs,
            out_specs=pl.BlockSpec((o_pad, edge_tile), lambda i: (0, i)),
        ),
        compiler_params=pltpu.CompilerParams(
            dimension_semantics=("parallel",)),   # edge tiles are independent (v7x: 2 TCs)
    )(*operands)

    # lane-dense transposed output -> slice off padding, return [num_edges, num_outputs]
    return jnp.transpose(out_t[:num_outputs, :num_edges])


# ---------------------------------------------------------------------------
# pure numpy reference (mirrors the PyTorch module)
# ---------------------------------------------------------------------------
def _reference_forward(node_embeddings, src_idx, dst_idx, weight, bias, *, edge_fn):
    emb = np.asarray(node_embeddings, dtype=np.float32)
    s = emb[np.asarray(src_idx)]
    d = emb[np.asarray(dst_idx)]
    if edge_fn == "concat":
        feat = np.concatenate([s, d], axis=1)
    elif edge_fn == "add":
        feat = s + d
    elif edge_fn == "mul":
        feat = s * d
    elif edge_fn == "mean":
        feat = (s + d) / 2.0
    elif edge_fn == "max":
        feat = np.maximum(s, d)
    elif edge_fn == "weighted_l1":
        feat = np.abs(s - d)
    elif edge_fn == "weighted_l2":
        feat = (s - d) ** 2
    else:
        raise ValueError(edge_fn)
    return feat @ np.asarray(weight, dtype=np.float32).T + np.asarray(bias, dtype=np.float32)


if __name__ == "__main__":
    vector_size = 32
    num_outputs = 4
    num_edges = 300

    key = jax.random.PRNGKey(0)
    k_edges, k_emb, k_w, k_b = jax.random.split(key, 4)

    # --- Python-level graph glue, as in EdgeInferenceModel.forward ------------
    raw = np.asarray(jax.random.randint(k_edges, (2, num_edges), 0, 40))
    src_ids = [int(x) for x in raw[0]]
    dst_ids = [int(x) for x in raw[1]]
    all_nodes = sorted({n for n in src_ids + dst_ids})
    nodes_mapping = {n: i for i, n in enumerate(all_nodes)}
    src_indices = jnp.asarray([nodes_mapping[n] for n in src_ids], dtype=jnp.int32)
    dst_indices = jnp.asarray([nodes_mapping[n] for n in dst_ids], dtype=jnp.int32)
    num_nodes = len(all_nodes)

    # TODO(synk): graph_embedder is an external module; modeled as a deterministic
    # [num_nodes, vector_size] embedding matrix.
    node_embeddings = jax.random.normal(k_emb, (num_nodes, vector_size), dtype=jnp.float32)

    for fn_i, edge_fn in enumerate(("concat", "max", "weighted_l2")):
        feat_dim = vector_size * (2 if edge_fn == "concat" else 1)
        kw = jax.random.fold_in(k_w, fn_i)
        kb = jax.random.fold_in(k_b, fn_i)
        weight = jax.random.normal(kw, (num_outputs, feat_dim), dtype=jnp.float32) * 0.1
        bias = jax.random.normal(kb, (num_outputs,), dtype=jnp.float32) * 0.1

        out = edge_inference_forward(node_embeddings, src_indices, dst_indices,
                                     weight, bias, edge_fn=edge_fn)
        out = jax.block_until_ready(out)

        ref = _reference_forward(node_embeddings, src_indices, dst_indices,
                                 weight, bias, edge_fn=edge_fn)
        np.testing.assert_allclose(np.asarray(out), ref, rtol=1e-4, atol=1e-4)

    print("KERNEL_OK")
</pallas_src>

<mosaic_0001>
module attributes {stable_mosaic.version = 11 : i64} {
  func.func @_concat_kernel(%arg0: i32, %arg1: memref<1x128xi32, #tpu.memory_space<vmem>>, %arg2: memref<1x128xi32, #tpu.memory_space<vmem>>, %arg3: memref<32x128xf32, #tpu.memory_space<vmem>>, %arg4: memref<8x32xf32, #tpu.memory_space<vmem>>, %arg5: memref<8x32xf32, #tpu.memory_space<vmem>>, %arg6: memref<8x1xf32, #tpu.memory_space<vmem>>, %arg7: memref<8x128xf32, #tpu.memory_space<vmem>>) attributes {dimension_semantics = [#tpu.dimension_semantics<parallel>], iteration_bounds = array<i64: 3>, scalar_prefetch = 0 : i64, scratch_operands = 0 : i64, tpu.core_type = #tpu.core_type<tc>, window_params = [{transform_indices = @transform_0, window_bounds = array<i64: 1, 128>}, {transform_indices = @transform_1, window_bounds = array<i64: 1, 128>}, {pipeline_mode = #tpu.pipeline_mode<synchronous>, transform_indices = @transform_2, window_bounds = array<i64: 32, 128>}, {pipeline_mode = #tpu.pipeline_mode<synchronous>, transform_indices = @transform_3, window_bounds = array<i64: 8, 32>}, {pipeline_mode = #tpu.pipeline_mode<synchronous>, transform_indices = @transform_4, window_bounds = array<i64: 8, 32>}, {pipeline_mode = #tpu.pipeline_mode<synchronous>, transform_indices = @transform_5, window_bounds = array<i64: 8, 1>}, {transform_indices = @transform_6, window_bounds = array<i64: 8, 128>}]} {
    %0 = tpu.iota {dimensions = array<i32: 0>} : vector<128x128xi32>
    %c0 = arith.constant 0 : index
    %c0_0 = arith.constant 0 : index
    %1 = vector.load %arg1[%c0, %c0_0] : memref<1x128xi32, #tpu.memory_space<vmem>>, vector<1x128xi32>
    %2 = vector.broadcast %1 : vector<1x128xi32> to vector<128x128xi32>
    %3 = arith.cmpi eq, %0, %2 : vector<128x128xi32>
    %4 = arith.extui %3 : vector<128x128xi1> to vector<128x128xi32>
    %5 = arith.sitofp %4 : vector<128x128xi32> to vector<128x128xf32>
    %c0_1 = arith.constant 0 : index
    %c0_2 = arith.constant 0 : index
    %6 = vector.load %arg2[%c0_1, %c0_2] : memref<1x128xi32, #tpu.memory_space<vmem>>, vector<1x128xi32>
    %7 = vector.broadcast %6 : vector<1x128xi32> to vector<128x128xi32>
    %8 = arith.cmpi eq, %0, %7 : vector<128x128xi32>
    %9 = arith.extui %8 : vector<128x128xi1> to vector<128x128xi32>
    %10 = arith.sitofp %9 : vector<128x128xi32> to vector<128x128xf32>
    %c0_3 = arith.constant 0 : index
    %c0_4 = arith.constant 0 : index
    %11 = vector.load %arg3[%c0_3, %c0_4] : memref<32x128xf32, #tpu.memory_space<vmem>>, vector<32x128xf32>
    %cst = arith.constant dense<0.000000e+00> : vector<32x128xf32>
    %12 = tpu.matmul %11, %5, %cst {dimension_numbers = #tpu.dot_dimension_numbers<[1], [0], [0], [1], [0, 0, 1, 1], [], []>} : vector<32x128xf32>, vector<128x128xf32>, vector<32x128xf32> -> vector<32x128xf32>
    %c0_5 = arith.constant 0 : index
    %c0_6 = arith.constant 0 : index
    %13 = vector.load %arg3[%c0_5, %c0_6] : memref<32x128xf32, #tpu.memory_space<vmem>>, vector<32x128xf32>
    %cst_7 = arith.constant dense<0.000000e+00> : vector<32x128xf32>
    %14 = tpu.matmul %13, %10, %cst_7 {dimension_numbers = #tpu.dot_dimension_numbers<[1], [0], [0], [1], [0, 0, 1, 1], [], []>} : vector<32x128xf32>, vector<128x128xf32>, vector<32x128xf32> -> vector<32x128xf32>
    %c0_8 = arith.constant 0 : index
    %c0_9 = arith.constant 0 : index
    %15 = vector.load %arg4[%c0_8, %c0_9] : memref<8x32xf32, #tpu.memory_space<vmem>>, vector<8x32xf32>
    %cst_10 = arith.constant dense<0.000000e+00> : vector<8x128xf32>
    %16 = tpu.matmul %15, %12, %cst_10 {dimension_numbers = #tpu.dot_dimension_numbers<[1], [0], [0], [1], [0, 0, 1, 1], [], []>} : vector<8x32xf32>, vector<32x128xf32>, vector<8x128xf32> -> vector<8x128xf32>
    %c0_11 = arith.constant 0 : index
    %c0_12 = arith.constant 0 : index
    %17 = vector.load %arg5[%c0_11, %c0_12] : memref<8x32xf32, #tpu.memory_space<vmem>>, vector<8x32xf32>
    %cst_13 = arith.constant dense<0.000000e+00> : vector<8x128xf32>
    %18 = tpu.matmul %17, %14, %cst_13 {dimension_numbers = #tpu.dot_dimension_numbers<[1], [0], [0], [1], [0, 0, 1, 1], [], []>} : vector<8x32xf32>, vector<32x128xf32>, vector<8x128xf32> -> vector<8x128xf32>
    %19 = arith.addf %16, %18 : vector<8x128xf32>
    %c0_14 = arith.constant 0 : index
    %c0_15 = arith.constant 0 : index
    %20 = vector.load %arg6[%c0_14, %c0_15] : memref<8x1xf32, #tpu.memory_space<vmem>>, vector<8x1xf32>
    %21 = vector.broadcast %20 : vector<8x1xf32> to vector<8x128xf32>
    %22 = arith.addf %19, %21 : vector<8x128xf32>
    %c0_16 = arith.constant 0 : index
    %c0_17 = arith.constant 0 : index
    %23 = vector.load %arg7[%c0_16, %c0_17] : memref<8x128xf32, #tpu.memory_space<vmem>>, vector<8x128xf32>
    tpu.vector_store %arg7[%c0_16, %c0_17], %22 {strides = array<i32>} : memref<8x128xf32, #tpu.memory_space<vmem>>, vector<8x128xf32>,
    return
  }
  func.func @transform_0(%arg0: i32) -> (i32, i32) {
    %c0_i32 = arith.constant 0 : i32
    %c0_i32_0 = arith.constant 0 : i32
    return %c0_i32, %arg0 : i32, i32
  }
  func.func @transform_1(%arg0: i32) -> (i32, i32) {
    %c0_i32 = arith.constant 0 : i32
    %c0_i32_0 = arith.constant 0 : i32
    return %c0_i32, %arg0 : i32, i32
  }
  func.func @transform_2(%arg0: i32) -> (i32, i32) {
    %c0_i32 = arith.constant 0 : i32
    %c0_i32_0 = arith.constant 0 : i32
    %c0_i32_1 = arith.constant 0 : i32
    return %c0_i32, %c0_i32_0 : i32, i32
  }
  func.func @transform_3(%arg0: i32) -> (i32, i32) {
    %c0_i32 = arith.constant 0 : i32
    %c0_i32_0 = arith.constant 0 : i32
    %c0_i32_1 = arith.constant 0 : i32
    return %c0_i32, %c0_i32_0 : i32, i32
  }
  func.func @transform_4(%arg0: i32) -> (i32, i32) {
    %c0_i32 = arith.constant 0 : i32
    %c0_i32_0 = arith.constant 0 : i32
    %c0_i32_1 = arith.constant 0 : i32
    return %c0_i32, %c0_i32_0 : i32, i32
  }
  func.func @transform_5(%arg0: i32) -> (i32, i32) {
    %c0_i32 = arith.constant 0 : i32
    %c0_i32_0 = arith.constant 0 : i32
    %c0_i32_1 = arith.constant 0 : i32
    return %c0_i32, %c0_i32_0 : i32, i32
  }
  func.func @transform_6(%arg0: i32) -> (i32, i32) {
    %c0_i32 = arith.constant 0 : i32
    %c0_i32_0 = arith.constant 0 : i32
    return %c0_i32, %arg0 : i32, i32
  }
}

</mosaic_0001>

<bundles_post_ra>
// kernel: tpu_custom_call.1
= control target key start
LH: loop header
LB: loop body
LE: loop exit
PB: predicated region body
PF: predicated region fallthrough
CT: control target
= control target key end

     0   :  { %s1851_s0 = inlined_call_operand.hbm [shape: s32[1,384], index: 0, kind: input, shape index: {}]   ;;  %s1852_s1 = inlined_call_operand.hbm [shape: s32[1,384], index: 1, kind: input, shape index: {}]   ;;  %s1853_s2 = inlined_call_operand.hbm [shape: f32[32,128], index: 2, kind: input, shape index: {}]   ;;  %s1854_s3 = inlined_call_operand.vmem [shape: f32[8,32], index: 3, kind: input, shape index: {}]   ;;  %s1855_s4 = inlined_call_operand.vmem [shape: f32[8,32], index: 4, kind: input, shape index: {}]   ;;  %s1856_s5 = inlined_call_operand.vmem [shape: f32[8,1], index: 5, kind: input, shape index: {}]   ;;  %s1857_s6 = inlined_call_operand.hbm [shape: f32[8,384], index: 6, kind: output, shape index: {}]  }
   0x1   :  { %1862 = sst [smem:[#allocation14_spill]] %s1851_s0 }
   0x2   :  { %1863 = sst [smem:[#allocation15_spill]] %s1853_s2 }
   0x3   :  { %11 = vsyncpa [#allocation3], 0 }
   0x4   :  { %13 = vsyncpa [#allocation3 + $0x1], 0 }
   0x5   :  { %14 = vsyncpa [#allocation6], 0 }
   0x6   :  { %16 = vsyncpa [#allocation6 + $0x1], 0 }
   0x7   :  { %17 = vsyncpa [#allocation4], 0 }
   0x8   :  { %19 = vsyncpa [#allocation4 + $0x1], 0  ;;  %s1461_s21 = smov 0   ;;  %s1463_s22 = smov 0  }
   0x9   :  { %s1465_s23 = smov 0   ;;  %s1467_s24 = smov 0  }
   0xa LB: > { %s1482_s25 = sadd.s32 4294967295, %s1413_s24   ;;  %s876_s26 = sadd.s32 4294967294, %s1413_s24   ;;  %s1413_s24 = sphi %s1467_s24, %s1901_s24   ;;  %s1409_s23 = sphi %s1465_s23, %s1900_s23   ;;  %s1405_s22 = sphi %s1463_s22, %s1899_s22   ;;  %s1401_s21 = sphi %s1461_s21, %s1898_s21  }
   0xb   : > { %p45_p0 = scmp.ne.s32.totalorder %s1405_s22, %s1401_s21  ;;  %p1858_p1 = scmp.eq.s32.totalorder %s1482_s25, 0 }
   0xc   : > { %p185_p3 = scmp.eq.s32.totalorder %s876_s26, 2  ;;  %p877_p5 = scmp.ge.s32.totalorder %s1413_s24, 1 }
   0xd   : > { %p1491_p4 = por %p1858_p1, %p45_p0  ;;  %p192_p7 = scmp.lt.s32.totalorder %s1413_s24, 4 }
   0xe   : > { %p1496_p6 = por %p185_p3, %p45_p0  ;;  %s1415_s30 = smov [#allocation7]  }
   0xf   : > { %s1864_s27 = scalar_select %p1491_p4, 1, 0 }
  0x10   : > { %s1865_s28 = scalar_select %p1496_p6, 1, 0 }
  0x11   : > { %p1501_p8 = pnand %p877_p5, %p192_p7  ;;  %s204_s7 = sshll.u32 %s1415_s30, 4  ;;  %s205_s7 = int_to_ptr.vmem [resolvable:$true] %s204_s7 }
  0x12   : > { %s1514_s9 = sadd.s32 1, %s1413_s24   ;;  %s32_s10 = sadd.s32 1, %s1409_s23 }
  0x13   : > { %s1866_s29 = scalar_select %p1501_p8, 1, 0 }
  0x14   : > { %p1191_p9 = pneg %p1501_p8  ;;  %s29_s11 = ssub.s32 %s1413_s24, %s1514_s9 }
  0x15   : > { %s1868_s2 = sld [smem:[#allocation15_spill]] }
  0x16   : > { %p1509_p10 = pnand %p1191_p9, %p1858_p1 }
  0x18   : > { %p1253_p12 = pneg %p1509_p10 }
  0x1b   : > { %s1251_s14 = scalar_lea.hbm %s1868_s2, 512 }
  0x1c   : > { %p1252_p11 = scmp.ne.s32.totalorder %s1868_s2, %s1251_s14  ;;  %p1258_p3 = scmp.lt.u32.totalorder %s1251_s14, %s1868_s2 }
  0x1e   : > { %p1254_p13 = pnand %p1253_p12, %p1252_p11 }
  0x20   : > { %p1255_p0 = pneg %p1254_p13 }
  0x22   : > { %p1260_p5 = pnand %p1258_p3, %p1255_p0 }
  0x24   : > { %1263 = shalt.err (!%p1260_p5)
}
  0x25   : > { %s1264_s19 = scalar_lea.vmem %s205_s7, 512  ;;  %p1272_p2 = scmp.lt.s32.totalorder %s205_s7, %s205_s7 }
  0x26   : > { %p1265_p7 = scmp.ne.s32.totalorder %s205_s7, %s1264_s19  ;;  %p1273_p6 = scmp.lt.s32.totalorder %s1264_s19, %s1264_s19 }
  0x28   : > { %p1267_p9 = pnand %p1265_p7, %p1253_p12  ;;  %p1274_p4 = por %p1273_p6, %p1272_p2 }
  0x2a   : > { %p1268_p1 = pneg %p1267_p9 }
  0x2c   : > { %p1275_p8 = pnand %p1274_p4, %p1268_p1 }
  0x2e   : > { %1278 = shalt.err (!%p1275_p8)
}
  0x2f   : > { %s1416_s20 = smov 128   ;;  %s1417_s26 = smov 8  }
  0x30   : > { %1194 = dma.hbm_to_vmem [thread:$0]  (!%p1509_p10), %s1868_s2, 512, %s205_s7, [#allocation6], %s1416_s20, %s1416_s20, %s1417_s26  }
  0x31   : > { %p30_p2 = scmp.eq.s32.totalorder %s29_s11, 0  ;;  %p39_p1 = scmp.ne.s32.totalorder %s1409_s23, %s1405_s22 }
  0x32   : > { %p40_p4 = scmp.eq.s32.totalorder %s1413_s24, 0  ;;  %p1207_p6 = scmp.lt.s32.totalorder %s1413_s24, 3 }
  0x33   : > { %s1540_s13 = scalar_select %p30_p2, %s1409_s23, %s32_s10  }
  0x34   : > { %p41_p8 = por %p40_p4, %p39_p1  ;;  %p1870_p11 = scmp.eq.s32.totalorder %s1482_s25, 2 }
  0x35   : > { %1869 = sst [smem:[#allocation13_spill]] %s1540_s13  ;;  %s1549_s15 = sand.u32 1, %s1409_s23  }
  0x36   : > { %p1544_p12 = por %p1870_p11, %p39_p1  ;;  %s880_s8 = sshll.u32 %s1413_s24, 4 }
  0x37   : > { %s1872_s0 = sld [smem:[#allocation14_spill]]  ;;  %s230_s10 = scalar_lea.vmem [#allocation2], %s1549_s15 }
  0x38   : > { %s1871_s14 = scalar_select %p1544_p12, 1, 0 }
  0x39   : > { %s237_s11 = sshll.u32 %s230_s10, 4  ;;  %p1560_p10 = pnand %p1207_p6, %p41_p8  ;;  %s1558_s11 = int_to_ptr.vmem [resolvable:$true] %s237_s11 }
  0x3a   : > { %s1568_s30 = scalar_lea.hbm %s1852_s1, %s880_s8  ;;  %s228_s12 = scalar_lea.sflag [#allocation3], %s1549_s15 }
  0x3b   : > { %p1281_p0 = pneg %p1560_p10 }
  0x3d   : > { %s1555_s7 = scalar_lea.hbm %s1872_s0, %s880_s8  ;;  %s1284_s2 = scalar_lea.hbm %s1872_s0, 48 }
  0x3e   : > { %s1279_s16 = scalar_lea.hbm %s1555_s7, 16  ;;  %p1285_p7 = scmp.lt.u32.totalorder %s1555_s7, %s1872_s0 }
  0x3f   : > { %p1280_p13 = scmp.ne.s32.totalorder %s1555_s7, %s1279_s16  ;;  %p1286_p9 = scmp.lt.u32.totalorder %s1284_s2, %s1279_s16 }
  0x40   : > { %p1288_p1 = scmp.lt.u32.totalorder %s1279_s16, %s1555_s7 }
  0x41   : > { %p1282_p3 = pnand %p1281_p0, %p1280_p13  ;;  %p1287_p2 = por %p1286_p9, %p1285_p7 }
  0x43   : > { %p1283_p5 = pneg %p1282_p3  ;;  %p1289_p4 = por %p1288_p1, %p1287_p2 }
  0x45   : > { %p1290_p6 = pnand %p1289_p4, %p1283_p5 }
  0x47   : > { %1293 = shalt.err (!%p1290_p6)
}
  0x48   : > { %s1294_s8 = scalar_lea.vmem %s1558_s11, 16  ;;  %s1418_s20 = smov [#allocation2]  }
  0x49   : > { %p1295_p8 = scmp.ne.s32.totalorder %s1558_s11, %s1294_s8  ;;  %s1299_s26 = sshll.u32 %s1418_s20, 4  ;;  %s1300_s26 = int_to_ptr.vmem [resolvable:$false] %s1299_s26 }
  0x4a   : > { %s1301_s13 = scalar_lea.vmem %s1300_s26, 32  ;;  %p1302_p3 = scmp.lt.s32.totalorder %s1558_s11, %s1300_s26 }
  0x4b   : > { %p1297_p11 = pnand %p1295_p8, %p1281_p0  ;;  %p1303_p7 = scmp.lt.s32.totalorder %s1301_s13, %s1294_s8 }
  0x4d   : > { %p1298_p13 = pneg %p1297_p11  ;;  %p1304_p9 = por %p1303_p7, %p1302_p3 }
  0x4f   : > { %p1305_p2 = pnand %p1304_p9, %p1298_p13 }
  0x51   : > { %1308 = shalt.err (!%p1305_p2)
}
  0x52   : > { %1198 = dma.hbm_to_vmem [thread:$0]  (!%p1560_p10), %s1555_s7, 16, %s1558_s11, %s228_s12  }
  0x53   : > { %s247_s2 = scalar_lea.vmem [#allocation5], %s1549_s15  ;;  %s1874_s16 = sand.u32 1, %s1413_s24  }
  0x54   : > { %s254_s19 = sshll.u32 %s247_s2, 4  ;;  %s245_s17 = scalar_lea.sflag [#allocation6], %s1874_s16  ;;  %s255_s19 = int_to_ptr.vmem [resolvable:$true] %s254_s19 }
  0x55   : > { %s1309_s10 = scalar_lea.hbm %s1568_s30, 16  ;;  %s1314_s26 = scalar_lea.hbm %s1852_s1, 48 }
  0x56   : > { %p1310_p5 = scmp.ne.s32.totalorder %s1568_s30, %s1309_s10  ;;  %p1315_p6 = scmp.lt.u32.totalorder %s1568_s30, %s1852_s1 }
  0x57   : > { %p1316_p8 = scmp.lt.u32.totalorder %s1314_s26, %s1309_s10  ;;  %p1318_p13 = scmp.lt.u32.totalorder %s1309_s10, %s1568_s30 }
  0x58   : > { %p1312_p1 = pnand %p1310_p5, %p1281_p0 }
  0x59   : > { %p1317_p11 = por %p1316_p8, %p1315_p6 }
  0x5a   : > { %p1313_p4 = pneg %p1312_p1 }
  0x5b   : > { %p1319_p3 = por %p1318_p13, %p1317_p11 }
  0x5d   : > { %p1320_p7 = pnand %p1319_p3, %p1313_p4 }
  0x5f   : > { %1323 = shalt.err (!%p1320_p7)
}
  0x60   : > { %s1324_s15 = scalar_lea.vmem %s255_s19, 16  ;;  %s1419_s7 = smov [#allocation5]  }
  0x61   : > { %p1325_p9 = scmp.ne.s32.totalorder %s255_s19, %s1324_s15  ;;  %s1329_s11 = sshll.u32 %s1419_s7, 4  ;;  %s1330_s11 = int_to_ptr.vmem [resolvable:$false] %s1329_s11 }
  0x62   : > { %s1331_s12 = scalar_lea.vmem %s1330_s11, 32  ;;  %p1332_p1 = scmp.lt.s32.totalorder %s255_s19, %s1330_s11 }
  0x63   : > { %p1327_p2 = pnand %p1325_p9, %p1281_p0  ;;  %p1333_p12 = scmp.lt.s32.totalorder %s1331_s12, %s1324_s15 }
  0x65   : > { %p1328_p5 = pneg %p1327_p2  ;;  %p1334_p6 = por %p1333_p12, %p1332_p1 }
  0x67   : > { %p1335_p8 = pnand %p1334_p6, %p1328_p5 }
  0x69   : > { %1338 = shalt.err (!%p1335_p8)
}
  0x6a   : > { %1201 = dma.hbm_to_vmem [thread:$0]  (!%p1560_p10), %s1568_s30, 16, %s255_s19, %s245_s17  }
  0x6b   : > { %p1875_p4 = scmp.ne.s32.totalorder %s1866_s29, 0 }
  0x6c   : > { %s1621_s0 = sand.u32 (!%p1875_p4), 1, %s1405_s22   ;;  %p1876_p0 = scmp.ne.s32.totalorder (!%p1875_p4), %s1864_s27, 0 }
  0x6d   : > { %263 = sbr.rel (%p1875_p4) target bundleno = 616 (0x268), region = 44  ;;  %s266_s2 = scalar_lea.sflag (!%p1875_p4), [#allocation3], %s1621_s0 }
  0x6e   : > { %s268_s16 = scalar_lea.vmem (!%p1875_p4), [#allocation2], %s1621_s0 }
  0x74   : > { %1384 = dma.done.wait (%p1876_p0), %s266_s2, 16  }
  0x75   : > { %1386 = vsyncadd (%p1876_p0), %s266_s2, 4294967280  ;;  %s273_s18 = sand.u32 1, %s1482_s25   ;;  %s276_s29 = scalar_lea.vmem [#allocation5], %s1621_s0 }
  0x76   : > { %s274_s30 = scalar_lea.sflag [#allocation6], %s273_s18 }
  0x77   : > { %1388 = dma.done.wait (%p1876_p0), %s274_s30, 16  }
  0x78   : > { %1390 = vsyncadd (%p1876_p0), %s274_s30, 4294967280  ;;  %p1877_p12 = scmp.eq.s32.totalorder %s1482_s25, 0 }
  0x7a   : > { %1392 = dma.done.wait (%p1877_p12), [#allocation6], 512   ;;  %p1878_p10 = pmov %p1877_p12 }
  0x7b   : > { %v312_v0 = vlaneseq  ;;  %v1646_v7 = vld [vmem:[%s268_s16] ss:$0 sm:$0xff]  ;;  %v435_v9 = vld [vmem:[#allocation7] sm:$0xff]  ;;  %v1420_v10 = vmov 1.0|1.0   ;;  %v436_v29 = vld [vmem:[#allocation7 + $0x8] sm:$0xff] }
  0x7c   : > { %1394 = vsyncadd (%p1878_p10), [#allocation6], 4294966784  ;;  %v1648_v8 = vld [vmem:[%s276_s29] ss:$0 sm:$0xff]  ;;  %1039 = vmatprep.mubr.f32.mxu0 %v435_v9  ;;  %1077 = vmatprep.mubr.f32.mxu1 %v435_v9  ;;  %v437_v30 = vld [vmem:[#allocation7 + $0x10] sm:$0xff]  ;;  %v1421_v32 = vmov 0.0|0.0  }
  0x7d   : > { %v1639_v1 = vshrl.u32 %v312_v0, 7  ;;  %v438_v31 = vld [vmem:[#allocation7 + $0x18] sm:$0xff]  ;;  %v1423_v33 = vmov 0.0   ;;  %v1424_v35 = vmov 0   ;;  %s884_s26 = sshll.u32 %s1621_s0, 3  ;;  %s954_s13 = sshll.u32 %s1482_s25, 7 }
  0x7e   : > { %v758_v34 = vld [vmem:[%s1856_s5] sm:$0xff]  ;;  %1250 = vset.pattern.permute.xlu0 %v1424_v35  ;;  %s311_s15 = scalar_lea.vmem [#allocation8], %s884_s26  ;;  %s1808_s2 = scalar_lea.hbm %s1857_s6, %s954_s13 }
  0x7f   : > { %v314_v2 = vadd.s32 8, %v1639_v1  ;;  %v315_v3 = vadd.s32 16, %v1639_v1  ;;  %v316_v4 = vadd.s32 24, %v1639_v1  ;;  %v317_v5 = vadd.s32 32, %v1639_v1  ;;  %761 = vperm.xlu0 %1250, %v758_v34   ;;  %v609_v48 = vld [vmem:[%s1854_s3] sm:$0xff]  ;;  %s780_s7 = sshll.u32 %s311_s15, 4  ;;  %s1810_s7 = int_to_ptr.vmem [resolvable:$true] %s780_s7 }
  0x80   : > { %v318_v6 = vadd.s32 40, %v1639_v1  ;;  %vm334_vm0 = vcmp.eq.s32.totalorder %v1639_v1, %v1646_v7  ;;  %vm387_vm2 = vcmp.eq.s32.totalorder %v1639_v1, %v1648_v8  ;;  %v319_v11 = vadd.s32 48, %v1639_v1  ;;  %v610_v49 = vld [vmem:[%s1855_s4] sm:$0xff]  ;;  %s767_s16 = scalar_lea.sflag [#allocation4], %s1621_s0  ;;  %s1339_s18 = scalar_lea.vmem %s1810_s7, 128 }
  0x81   : > { %vm335_vm1 = vcmp.eq.s32.totalorder %v314_v2, %v1646_v7  ;;  %vm388_vm3 = vcmp.eq.s32.totalorder %v314_v2, %v1648_v8  ;;  %vm336_vm5 = vcmp.eq.s32.totalorder %v315_v3, %v1646_v7  ;;  %vm337_vm6 = vcmp.eq.s32.totalorder %v316_v4, %v1646_v7  ;;  %p1340_p11 = scmp.ne.s32.totalorder %s1810_s7, %s1339_s18  ;;  %p1895_p13 = scmp.ne.s32.totalorder %s1871_s14, 0 }
  0x82   : > { %vm1105_vm4 = vmpackc.low %vm335_vm1, %vm334_vm0  ;;  %vm389_vm7 = vcmp.eq.s32.totalorder %v315_v3, %v1648_v8  ;;  %vm390_vm8 = vcmp.eq.s32.totalorder %v316_v4, %v1648_v8  ;;  %vm338_vm10 = vcmp.eq.s32.totalorder %v317_v5, %v1646_v7  ;;  %vm339_vm11 = vcmp.eq.s32.totalorder %v318_v6, %v1646_v7  ;;  %s1425_s25 = smov [#allocation8]  }
  0x83   : > { %1106 = vmatprep.subr.msk.bf16.mxu0 %vm1105_vm4, %v1420_v10  ;;  %vm1137_vm9 = vmpackc.low %vm388_vm3, %vm387_vm2  ;;  %v320_v12 = vadd.s32 56, %v1639_v1  ;;  %vm391_vm13 = vcmp.eq.s32.totalorder %v317_v5, %v1648_v8  ;;  %vm392_vm14 = vcmp.eq.s32.totalorder %v318_v6, %v1648_v8  ;;  %vm340_vm2 = vcmp.eq.s32.totalorder %v319_v11, %v1646_v7  ;;  %p1341_p3 = pnand %p1340_p11, %p1895_p13  ;;  %s1343_s30 = sshll.u32 %s1425_s25, 4  ;;  %s1344_s30 = int_to_ptr.vmem [resolvable:$false] %s1343_s30 }
  0x84   : > { %1138 = vmatprep.subr.msk.bf16.mxu1 %vm1137_vm9, %v1420_v10  ;;  %1108 = vmatpush3.bf16.msk.msra.mxu0 %vm1105_vm4, %v1420_v10  ;;  %vm1109_vm12 = vmpackc.low %vm337_vm6, %vm336_vm5  ;;  %v321_v15 = vadd.s32 64, %v1639_v1  ;;  %v322_v16 = vadd.s32 72, %v1639_v1  ;;  %vm393_vm4 = vcmp.eq.s32.totalorder %v319_v11, %v1648_v8  ;;  %v323_v19 = vadd.s32 80, %v1639_v1  ;;  %s1345_s29 = scalar_lea.vmem %s1344_s30, 256  ;;  %p1346_p9 = scmp.lt.s32.totalorder %s1810_s7, %s1344_s30 }
  0x85   : > { %1140 = vmatpush3.bf16.msk.msra.mxu1 %vm1137_vm9, %v1420_v10  ;;  %1110 = vmatprep.subr.msk.bf16.mxu0 %vm1109_vm12, %v1420_v10  ;;  %vm1141_vm15 = vmpackc.low %vm390_vm8, %vm389_vm7  ;;  %vm341_vm3 = vcmp.eq.s32.totalorder %v320_v12, %v1646_v7  ;;  %vm394_vm5 = vcmp.eq.s32.totalorder %v320_v12, %v1648_v8  ;;  %v324_v20 = vadd.s32 88, %v1639_v1  ;;  %v325_v23 = vadd.s32 96, %v1639_v1  ;;  %p1342_p7 = pneg %p1341_p3  ;;  %p1347_p2 = scmp.lt.s32.totalorder %s1345_s29, %s1339_s18 }
  0x86   : > { %1142 = vmatprep.subr.msk.bf16.mxu1 %vm1141_vm15, %v1420_v10  ;;  %vm1676_vm0 = vmpackc.low %vm339_vm11, %vm338_vm10  ;;  %vm342_vm8 = vcmp.eq.s32.totalorder %v321_v15, %v1646_v7  ;;  %vm343_vm9 = vcmp.eq.s32.totalorder %v322_v16, %v1646_v7  ;;  %vm395_vm10 = vcmp.eq.s32.totalorder %v321_v15, %v1648_v8  ;;  %vm396_vm11 = vcmp.eq.s32.totalorder %v322_v16, %v1648_v8 }
  0x87   : > { %vm1680_vm1 = vmpackc.low %vm392_vm14, %vm391_vm13  ;;  %vm344_vm14 = vcmp.eq.s32.totalorder %v323_v19, %v1646_v7  ;;  %v326_v24 = vadd.s32 104, %v1639_v1  ;;  %v327_v27 = vadd.s32 112, %v1639_v1  ;;  %v328_v28 = vadd.s32 120, %v1639_v1  ;;  %p1348_p5 = por %p1347_p2, %p1346_p9 }
  0x88   : > { %1112 = vmatpush3.bf16.msk.msra.mxu0 %vm1109_vm12, %v1420_v10  ;;  %vm1698_vm6 = vmpackc.low %vm341_vm3, %vm340_vm2 }
  0x89   : > { %1144 = vmatpush3.bf16.msk.msra.mxu1 %vm1141_vm15, %v1420_v10  ;;  %1114 = vmatprep.subr.msk.bf16.mxu0 %vm1676_vm0, %v1420_v10  ;;  %vm1702_vm7 = vmpackc.low %vm394_vm5, %vm393_vm4  ;;  %vm345_vm15 = vcmp.eq.s32.totalorder %v324_v20, %v1646_v7  ;;  %vm346_vm4 = vcmp.eq.s32.totalorder %v325_v23, %v1646_v7  ;;  %vm347_vm5 = vcmp.eq.s32.totalorder %v326_v24, %v1646_v7  ;;  %p1349_p1 = pnand %p1348_p5, %p1342_p7 }
  0x8a   : > { %1146 = vmatprep.subr.msk.bf16.mxu1 %vm1680_vm1, %v1420_v10  ;;  %vm1724_vm12 = vmpackc.low %vm343_vm9, %vm342_vm8 }
  0x8b   : > { %vm1728_vm13 = vmpackc.low %vm396_vm11, %vm395_vm10  ;;  %vm348_vm10 = vcmp.eq.s32.totalorder %v327_v27, %v1646_v7  ;;  %vm349_vm11 = vcmp.eq.s32.totalorder %v328_v28, %v1646_v7 }
  0x8c   : > { %1116 = vmatpush3.bf16.msk.msra.mxu0 %vm1676_vm0, %v1420_v10  ;;  %vm397_vm0 = vcmp.eq.s32.totalorder %v323_v19, %v1648_v8  ;;  %vm1750_vm2 = vmpackc.low %vm345_vm15, %vm344_vm14 }
  0x8d   : > { %1148 = vmatpush3.bf16.msk.msra.mxu1 %vm1680_vm1, %v1420_v10  ;;  %1118 = vmatprep.subr.msk.bf16.mxu0 %vm1698_vm6, %v1420_v10  ;;  %vm398_vm1 = vcmp.eq.s32.totalorder %v324_v20, %v1648_v8  ;;  %vm1129_vm8 = vmpackc.low %vm347_vm5, %vm346_vm4 }
  0x8e   : > { %1150 = vmatprep.subr.msk.bf16.mxu1 %vm1702_vm7, %v1420_v10  ;;  %vm1754_vm3 = vmpackc.low %vm398_vm1, %vm397_vm0  ;;  %vm1422_vm0 = vmmov 0   ;;  %vm611_vm1 = vcmask 261120  }
  0x8f   : > { %vm1133_vm14 = vmpackc.low %vm349_vm11, %vm348_vm10 }
  0x90   : > { %1120 = vmatpush3.bf16.msk.msra.mxu0 %vm1698_vm6, %v1420_v10  ;;  %vm399_vm6 = vcmp.eq.s32.totalorder %v325_v23, %v1648_v8 }
  0x91   : > { %1152 = vmatpush3.bf16.msk.msra.mxu1 %vm1702_vm7, %v1420_v10  ;;  %1122 = vmatprep.subr.msk.bf16.mxu0 %vm1724_vm12, %v1420_v10  ;;  %vm400_vm7 = vcmp.eq.s32.totalorder %v326_v24, %v1648_v8 }
  0x92   : > { %1154 = vmatprep.subr.msk.bf16.mxu1 %vm1728_vm13, %v1420_v10  ;;  %vm1161_vm9 = vmpackc.low %vm400_vm7, %vm399_vm6 }
  0x94   : > { %1124 = vmatpush3.bf16.msk.msra.mxu0 %vm1724_vm12, %v1420_v10  ;;  %vm401_vm12 = vcmp.eq.s32.totalorder %v327_v27, %v1648_v8 }
  0x95   : > { %1156 = vmatpush3.bf16.msk.msra.mxu1 %vm1728_vm13, %v1420_v10  ;;  %1126 = vmatprep.subr.msk.bf16.mxu0 %vm1750_vm2, %v1420_v10  ;;  %vm402_vm13 = vcmp.eq.s32.totalorder %v328_v28, %v1648_v8 }
  0x96   : > { %1158 = vmatprep.subr.msk.bf16.mxu1 %vm1754_vm3, %v1420_v10  ;;  %vm1165_vm15 = vmpackc.low %vm402_vm13, %vm401_vm12 }
  0x98   : > { %1128 = vmatpush3.bf16.msk.msra.mxu0 %vm1750_vm2, %v1420_v10 }
  0x99   : > { %1160 = vmatpush3.bf16.msk.msra.mxu1 %vm1754_vm3, %v1420_v10  ;;  %1130 = vmatprep.subr.msk.bf16.mxu0 %vm1129_vm8, %v1420_v10 }
  0x9a   : > { %1162 = vmatprep.subr.msk.bf16.mxu1 %vm1161_vm9, %v1420_v10 }
  0x9c   : > { %1132 = vmatpush3.bf16.msk.msra.mxu0 %vm1129_vm8, %v1420_v10 }
  0x9d   : > { %1164 = vmatpush3.bf16.msk.msra.mxu1 %vm1161_vm9, %v1420_v10  ;;  %1134 = vmatprep.subr.msk.bf16.mxu0 %vm1133_vm14, %v1420_v10 }
  0x9e   : > { %1166 = vmatprep.subr.msk.bf16.mxu1 %vm1165_vm15, %v1420_v10 }
  0xa0   : > { %1136 = vmatpush3.bf16.msk.msra.mxu0 %vm1133_vm14, %v1420_v10 }
  0xa1   : > { %1168 = vmatpush3.bf16.msk.msra.mxu1 %vm1165_vm15, %v1420_v10  ;;  %1169 = vmatprep.subr.bf16.mxu0 %v1421_v32 }
  0xa2   : > { %1175 = vmatprep.subr.bf16.mxu1 %v1421_v32 }
  0xa3   : > { %1040 = vmatmul.mubr.f32.vlgmr.msra.gmra.mrb[0].mxu0 %v436_v29 }
  0xa4   : > { %1078 = vmatmul.mubr.f32.vlgmr.msra.gmra.mrb[0].mxu1 %v436_v29  ;;  %1042 = vmatprep.mubr.f32.mxu0 %v437_v30 }
  0xa5   : > { %1080 = vmatprep.mubr.f32.mxu1 %v437_v30 }
  0xa7   : > { %1043 = vmatmul.mubr.f32.gmra.mrb[2].mxu0 %v438_v31 }
  0xa8   : > { %1081 = vmatmul.mubr.f32.gmra.mrb[2].mxu1 %v438_v31  ;;  %1091 = vmatprep.mubr.msk.f32.mxu0 %vm1422_vm0, %v1423_v33 }
  0xa9   : > { %1102 = vmatprep.mubr.msk.f32.mxu1 %vm1422_vm0, %v1423_v33 }
  0xfe   : > { %v762_v51 = vpop.permute.xlu0 %761 }
 0x176   : > { %v1041_v36 = vpop.f32.mrb[0].mxu0 }
 0x177   : > { %v1079_v37 = vpop.f32.mrb[0].mxu1  ;;  %v505_v38 = vpop.f32.mrb[1].mxu0 }
 0x178   : > { %v1176_v39 = vpack.c.bf16 %v1041_v36, %v505_v38  ;;  %v590_v40 = vpop.f32.mrb[1].mxu1 }
 0x179   : > { %v1170_v41 = vpack.c.bf16 %v1079_v37, %v590_v40 }
 0x17a   : > { %v1044_v42 = vpop.f32.mrb[2].mxu0  ;;  %1177 = vmatpush3.bf16.msra.mxu1 %v1176_v39 }
 0x17b   : > { %v1082_v43 = vpop.f32.mrb[2].mxu1  ;;  %1171 = vmatpush3.bf16.msra.mxu0 %v1170_v41  ;;  %v515_v44 = vpop.f32.mrb[3].mxu0  ;;  %1178 = vmatprep.subr.bf16.mxu1 %v1421_v32 }
 0x17c   : > { %v1179_v45 = vpack.c.bf16 %v1044_v42, %v515_v44  ;;  %v600_v46 = vpop.f32.mrb[3].mxu1  ;;  %1172 = vmatprep.subr.bf16.mxu0 %v1421_v32 }
 0x17d   : > { %v1173_v47 = vpack.c.bf16 %v1082_v43, %v600_v46 }
 0x17e   : > { %1180 = vmatpush3.bf16.msra.mxu1 %v1179_v45 }
 0x17f   : > { %1174 = vmatpush3.bf16.msra.mxu0 %v1173_v47 }
 0x181   : > { %1103 = vmatmul.mubr.msk.f32.vlgmr.msra.gmra.mrb[4].mxu1 %vm611_vm1, %v609_v48 }
 0x182   : > { %1092 = vmatmul.mubr.msk.f32.vlgmr.msra.gmra.mrb[4].mxu0 %vm611_vm1, %v610_v49 }
 0x254   : > { %v754_v50 = vpop.f32.mrb[4].mxu1 }
 0x255   : > { %v681_v52 = vpop.f32.mrb[4].mxu0  ;;  %v1104_v53 = vpop.f32.mrb[5].mxu1 }
 0x256   : > { %v755_v54 = vadd.f32 %v754_v50, %v681_v52  ;;  %v1093_v55 = vpop.f32.mrb[5].mxu0 }
 0x258   : > { %v764_v56 = vadd.f32 %v762_v51, %v755_v54 }
 0x25a   : > { %765 = vst [vmem:[%s311_s15] sm:$0xff] %v764_v56 }
 0x25b   : > { %1352 = shalt.err (!%p1349_p1)
}
 0x25c   : > { %s1353_s0 = scalar_lea.hbm %s1808_s2, 128  ;;  %s1357_s17 = scalar_lea.hbm %s1857_s6, 384 }
 0x25d   : > { %p1354_p6 = scmp.ne.s32.totalorder %s1808_s2, %s1353_s0  ;;  %p1358_p0 = scmp.lt.u32.totalorder %s1808_s2, %s1857_s6 }
 0x25e   : > { %p1359_p12 = scmp.lt.u32.totalorder %s1357_s17, %s1353_s0  ;;  %p1361_p11 = scmp.lt.u32.totalorder %s1353_s0, %s1808_s2 }
 0x25f   : > { %p1355_p8 = pnand %p1354_p6, %p1895_p13 }
 0x260   : > { %p1360_p10 = por %p1359_p12, %p1358_p0 }
 0x261   : > { %p1356_p4 = pneg %p1355_p8 }
 0x262   : > { %p1362_p3 = por %p1361_p11, %p1360_p10 }
 0x264   : > { %p1363_p7 = pnand %p1362_p3, %p1356_p4 }
 0x266   : > { %1366 = shalt.err (!%p1363_p7)
}
 0x267   : > { %1189 = dma.vmem_to_hbm [thread:$0]  (%p1895_p13), %s1810_s7, 128, %s1808_s2, %s767_s16  }
 0x268 PF: > { %p1209_p9 = scmp.ge.s32.totalorder %s1413_s24, 2  ;;  %s792_s20 = sand.u32 1, %s1401_s21  }
 0x269   : > { %p1896_p2 = scmp.ne.s32.totalorder %s1865_s28, 0  ;;  %s793_s26 = scalar_lea.sflag [#allocation4], %s792_s20 }
 0x26b   : > { %p1203_p5 = pnand %p1209_p9, %p1896_p2 }
 0x26d   : > { %1396 = dma.done.wait (!%p1203_p5), %s793_s26, 128  }
 0x26e   : > { %1398 = vsyncadd (!%p1203_p5), %s793_s26, 4294967168  ;;  %s1897_s13 = sld [smem:[#allocation13_spill]]  ;;  %p22_p1 = scmp.ge.s32.totalorder %s1514_s9, 5  }
 0x26f   : > { %s1898_s21 = smov %s1405_s22  ;;  %s1899_s22 = smov %s1409_s23 }
 0x270   : > { %s1901_s24 = smov %s1514_s9  ;;  %24 = sbr.rel (!%p22_p1) target bundleno = 10 (0xa), region = 106 }
 0x274   : > { %s1900_s23 = smov %s1897_s13 }
 0x277   :  { %798 = vsyncpa [#allocation3], 1 }
 0x278   :  { %800 = vsyncpa [#allocation3 + $0x1], 1 }
 0x279   :  { %801 = vsyncpa [#allocation6], 1 }
 0x27a   :  { %803 = vsyncpa [#allocation6 + $0x1], 1 }
 0x27b   :  { %804 = vsyncpa [#allocation4], 1 }
 0x27c   :  { %806 = vsyncpa [#allocation4 + $0x1], 1 }

</bundles_post_ra>
